<compile_context>
chip_gen: v6e
topology: v6e:2x2x1
jax: 0.10.0
libtpu: 0.0.40
codegen_flags: <defaults>
</compile_context>

<pallas_src>
import jax
import jax.numpy as jnp
from jax.experimental import pallas as pl
from jax.experimental.pallas import tpu as pltpu


def mlp_kernel(x_ref, w1_ref, b1_ref, w2_ref, b2_ref, o_ref):
    # Layer 1: relu(x @ W1 + b1)  -- bf16 operands, f32 accumulate.
    h = jnp.dot(x_ref[...], w1_ref[...],
                preferred_element_type=jnp.float32) + b1_ref[...]
    h = jnp.maximum(h, 0.0)
    # Dropout: identity in eval mode (see TODO at top).
    # Layer 2: h @ W2 + b2  -- cast activations back to bf16 for the MXU.
    o_ref[...] = jnp.dot(h.astype(w2_ref.dtype), w2_ref[...],
                         preferred_element_type=jnp.float32) + b2_ref[...]


def _round_up(v, m):
    return (v + m - 1) // m * m


def preg_mlp_forward(x, edge_index, w1, b1, w2, b2, *, tile_m=128):
    """PREGMLP.forward: fused MLP.  edge_index is accepted but unused (matches spec)."""
    del edge_index  # forward() ignores the graph structure
    n, f = x.shape
    hidden = w1.shape[1]
    c = w2.shape[1]

    n_pad = _round_up(max(n, tile_m), tile_m)
    f_pad = _round_up(f, 128)
    h_pad = _round_up(hidden, 128)
    c_pad = _round_up(c, 128)

    # Lane-dense, bf16 padded operands (zero padding is exact: padded hidden
    # columns are relu(0) = 0 and meet zero rows of W2, so output is unchanged).
    xp = jnp.zeros((n_pad, f_pad), jnp.bfloat16).at[:n, :f].set(
        x.astype(jnp.bfloat16))
    w1p = jnp.zeros((f_pad, h_pad), jnp.bfloat16).at[:f, :hidden].set(
        w1.astype(jnp.bfloat16))
    b1p = jnp.zeros((1, h_pad), jnp.float32).at[:, :hidden].set(
        b1.reshape(1, -1).astype(jnp.float32))
    w2p = jnp.zeros((h_pad, c_pad), jnp.bfloat16).at[:hidden, :c].set(
        w2.astype(jnp.bfloat16))
    b2p = jnp.zeros((1, c_pad), jnp.float32).at[:, :c].set(
        b2.reshape(1, -1).astype(jnp.float32))

    grid = (n_pad // tile_m,)
    out = pl.pallas_call(
        mlp_kernel,
        out_shape=jax.ShapeDtypeStruct((n_pad, c_pad), jnp.float32),
        grid_spec=pltpu.PrefetchScalarGridSpec(
            num_scalar_prefetch=0,
            grid=grid,
            in_specs=[
                pl.BlockSpec((tile_m, f_pad), lambda i: (i, 0)),  # x row tile
                pl.BlockSpec((f_pad, h_pad), lambda i: (0, 0)),   # W1 (resident)
                pl.BlockSpec((1, h_pad), lambda i: (0, 0)),       # b1
                pl.BlockSpec((h_pad, c_pad), lambda i: (0, 0)),   # W2 (resident)
                pl.BlockSpec((1, c_pad), lambda i: (0, 0)),       # b2
            ],
            out_specs=pl.BlockSpec((tile_m, c_pad), lambda i: (i, 0)),
        ),
        compiler_params=pltpu.CompilerParams(
            dimension_semantics=("parallel",),
            vmem_limit_bytes=32 << 20,
        ),
    )(xp, w1p, b1p, w2p, b2p)
    return out[:n, :c]


def glorot(key, shape):
    fan_in, fan_out = shape
    limit = jnp.sqrt(6.0 / (fan_in + fan_out))
    return jax.random.uniform(key, shape, jnp.float32, -limit, limit)


if __name__ == "__main__":
    num_nodes = 256
    num_features = 16
    num_classes = 8
    hidden_channels = 64   # fixed by PREGMLP: MLP(num_features, num_classes, 64)
    num_edges = 64

    key = jax.random.PRNGKey(0)
    k_x, k_e, k_w1, k_w2 = jax.random.split(key, 4)

    # Node features
    x = jax.random.normal(k_x, (num_nodes, num_features), dtype=jnp.float32)

    # edge_index (2, E) — present to match the module signature; unused by forward.
    src = jax.random.randint(k_e, (num_edges // 2,), 0, num_nodes)
    dst = jax.random.randint(jax.random.fold_in(k_e, 1), (num_edges // 2,), 0,
                             num_nodes)
    edge_index = jnp.stack([jnp.concatenate([src, dst]),
                            jnp.concatenate([dst, src])]).astype(jnp.int32)

    # Deterministic parameters: glorot weights, zero biases (reset_parameters()).
    w1 = glorot(k_w1, (num_features, hidden_channels))
    b1 = jnp.zeros((hidden_channels,), dtype=jnp.float32)
    w2 = glorot(k_w2, (hidden_channels, num_classes))
    b2 = jnp.zeros((num_classes,), dtype=jnp.float32)

    out = preg_mlp_forward(x, edge_index, w1, b1, w2, b2)
    jax.block_until_ready(out)

    # Reference (plain JAX) mirroring the kernel's bf16 dtype flow.
    xb = x.astype(jnp.bfloat16).astype(jnp.float32)
    w1b = w1.astype(jnp.bfloat16).astype(jnp.float32)
    w2b = w2.astype(jnp.bfloat16).astype(jnp.float32)
    h_ref = jnp.maximum(xb @ w1b + b1[None, :], 0.0)
    out_ref = h_ref.astype(jnp.bfloat16).astype(jnp.float32) @ w2b + b2[None, :]
    assert out.shape == (num_nodes, num_classes)
    assert jnp.allclose(out, out_ref, atol=1e-2, rtol=1e-2)

    print("KERNEL_OK")
</pallas_src>

<mosaic_0001>
module attributes {stable_mosaic.version = 11 : i64} {
  func.func @mlp_kernel(%arg0: i32, %arg1: memref<128x128xbf16, #tpu.memory_space<vmem>>, %arg2: memref<128x128xbf16, #tpu.memory_space<vmem>>, %arg3: memref<1x128xf32, #tpu.memory_space<vmem>>, %arg4: memref<128x128xbf16, #tpu.memory_space<vmem>>, %arg5: memref<1x128xf32, #tpu.memory_space<vmem>>, %arg6: memref<128x128xf32, #tpu.memory_space<vmem>>) attributes {dimension_semantics = [#tpu.dimension_semantics<parallel>], iteration_bounds = array<i64: 2>, scalar_prefetch = 0 : i64, scratch_operands = 0 : i64, tpu.core_type = #tpu.core_type<tc>, window_params = [{transform_indices = @transform_0, window_bounds = array<i64: 128, 128>}, {pipeline_mode = #tpu.pipeline_mode<synchronous>, transform_indices = @transform_1, window_bounds = array<i64: 128, 128>}, {pipeline_mode = #tpu.pipeline_mode<synchronous>, transform_indices = @transform_2, window_bounds = array<i64: 1, 128>}, {pipeline_mode = #tpu.pipeline_mode<synchronous>, transform_indices = @transform_3, window_bounds = array<i64: 128, 128>}, {pipeline_mode = #tpu.pipeline_mode<synchronous>, transform_indices = @transform_4, window_bounds = array<i64: 1, 128>}, {transform_indices = @transform_5, window_bounds = array<i64: 128, 128>}]} {
    %c0 = arith.constant 0 : index
    %c0_0 = arith.constant 0 : index
    %0 = vector.load %arg1[%c0, %c0_0] : memref<128x128xbf16, #tpu.memory_space<vmem>>, vector<128x128xbf16>
    %c0_1 = arith.constant 0 : index
    %c0_2 = arith.constant 0 : index
    %1 = vector.load %arg2[%c0_1, %c0_2] : memref<128x128xbf16, #tpu.memory_space<vmem>>, vector<128x128xbf16>
    %cst = arith.constant dense<0.000000e+00> : vector<128x128xf32>
    %2 = tpu.matmul %0, %1, %cst {dimension_numbers = #tpu.dot_dimension_numbers<[1], [0], [0], [1], [0, 0, 1, 1], [], []>} : vector<128x128xbf16>, vector<128x128xbf16>, vector<128x128xf32> -> vector<128x128xf32>
    %c0_3 = arith.constant 0 : index
    %c0_4 = arith.constant 0 : index
    %3 = vector.load %arg3[%c0_3, %c0_4] : memref<1x128xf32, #tpu.memory_space<vmem>>, vector<1x128xf32>
    %4 = vector.broadcast %3 : vector<1x128xf32> to vector<128x128xf32>
    %5 = arith.addf %2, %4 : vector<128x128xf32>
    %cst_5 = arith.constant 0.000000e+00 : f32
    %6 = vector.broadcast %cst_5 : f32 to vector<128x128xf32>
    %7 = arith.maximumf %5, %6 : vector<128x128xf32>
    %8 = arith.truncf %7 : vector<128x128xf32> to vector<128x128xbf16>
    %c0_6 = arith.constant 0 : index
    %c0_7 = arith.constant 0 : index
    %9 = vector.load %arg4[%c0_6, %c0_7] : memref<128x128xbf16, #tpu.memory_space<vmem>>, vector<128x128xbf16>
    %cst_8 = arith.constant dense<0.000000e+00> : vector<128x128xf32>
    %10 = tpu.matmul %8, %9, %cst_8 {dimension_numbers = #tpu.dot_dimension_numbers<[1], [0], [0], [1], [0, 0, 1, 1], [], []>} : vector<128x128xbf16>, vector<128x128xbf16>, vector<128x128xf32> -> vector<128x128xf32>
    %c0_9 = arith.constant 0 : index
    %c0_10 = arith.constant 0 : index
    %11 = vector.load %arg5[%c0_9, %c0_10] : memref<1x128xf32, #tpu.memory_space<vmem>>, vector<1x128xf32>
    %12 = vector.broadcast %11 : vector<1x128xf32> to vector<128x128xf32>
    %13 = arith.addf %10, %12 : vector<128x128xf32>
    %c0_11 = arith.constant 0 : index
    %c0_12 = arith.constant 0 : index
    %14 = vector.load %arg6[%c0_11, %c0_12] : memref<128x128xf32, #tpu.memory_space<vmem>>, vector<128x128xf32>
    tpu.vector_store %arg6[%c0_11, %c0_12], %13 {strides = array<i32>} : memref<128x128xf32, #tpu.memory_space<vmem>>, vector<128x128xf32>,
    return
  }
  func.func @transform_0(%arg0: i32) -> (i32, i32) {
    %c0_i32 = arith.constant 0 : i32
    %c0_i32_0 = arith.constant 0 : i32
    return %arg0, %c0_i32 : i32, i32
  }
  func.func @transform_1(%arg0: i32) -> (i32, i32) {
    %c0_i32 = arith.constant 0 : i32
    %c0_i32_0 = arith.constant 0 : i32
    %c0_i32_1 = arith.constant 0 : i32
    return %c0_i32, %c0_i32_0 : i32, i32
  }
  func.func @transform_2(%arg0: i32) -> (i32, i32) {
    %c0_i32 = arith.constant 0 : i32
    %c0_i32_0 = arith.constant 0 : i32
    %c0_i32_1 = arith.constant 0 : i32
    return %c0_i32, %c0_i32_0 : i32, i32
  }
  func.func @transform_3(%arg0: i32) -> (i32, i32) {
    %c0_i32 = arith.constant 0 : i32
    %c0_i32_0 = arith.constant 0 : i32
    %c0_i32_1 = arith.constant 0 : i32
    return %c0_i32, %c0_i32_0 : i32, i32
  }
  func.func @transform_4(%arg0: i32) -> (i32, i32) {
    %c0_i32 = arith.constant 0 : i32
    %c0_i32_0 = arith.constant 0 : i32
    %c0_i32_1 = arith.constant 0 : i32
    return %c0_i32, %c0_i32_0 : i32, i32
  }
  func.func @transform_5(%arg0: i32) -> (i32, i32) {
    %c0_i32 = arith.constant 0 : i32
    %c0_i32_0 = arith.constant 0 : i32
    return %arg0, %c0_i32 : i32, i32
  }
}

</mosaic_0001>

<bundles_post_ra>
// kernel: tpu_custom_call.1
= control target key start
LH: loop header
LB: loop body
LE: loop exit
PB: predicated region body
PF: predicated region fallthrough
CT: control target
= control target key end

     0   :  { %10 = vsyncpa [#allocation3], 0  ;;  %s1479_s0 = inlined_call_operand.hbm [shape: bf16[256,128], index: 0, kind: input, shape index: {}]   ;;  %s1480_s1 = inlined_call_operand.hbm [shape: bf16[128,128], index: 1, kind: input, shape index: {}]   ;;  %s1481_s2 = inlined_call_operand.vmem [shape: f32[1,128], index: 2, kind: input, shape index: {}]   ;;  %s1482_s3 = inlined_call_operand.hbm [shape: bf16[128,128], index: 3, kind: input, shape index: {}]   ;;  %s1483_s4 = inlined_call_operand.vmem [shape: f32[1,128], index: 4, kind: input, shape index: {}]   ;;  %s1484_s5 = inlined_call_operand.hbm [shape: f32[256,128], index: 5, kind: output, shape index: {}]  }
   0x1   :  { %12 = vsyncpa [#allocation3 + $0x1], 0 }
   0x2   :  { %13 = vsyncpa [#allocation6], 0 }
   0x3   :  { %14 = vsyncpa [#allocation4], 0 }
   0x4   :  { %16 = vsyncpa [#allocation4 + $0x1], 0  ;;  %s1246_s18 = smov 0   ;;  %s1248_s19 = smov 0  }
   0x5   :  { %s1250_s20 = smov 0   ;;  %s1252_s21 = smov 0  }
   0x6 LB: > { %s1267_s22 = sadd.s32 4294967295, %s1206_s21   ;;  %s821_s23 = sadd.s32 4294967294, %s1206_s21   ;;  %s1206_s21 = sphi %s1252_s21, %s1507_s21   ;;  %s1202_s20 = sphi %s1250_s20, %s1506_s20   ;;  %s1198_s19 = sphi %s1248_s19, %s1505_s19   ;;  %s1194_s18 = sphi %s1246_s18, %s1504_s18  }
   0x7   : > { %p42_p0 = scmp.ne.s32.totalorder %s1198_s19, %s1194_s18  ;;  %p1485_p1 = scmp.eq.s32.totalorder %s1267_s22, 0 }
   0x8   : > { %p150_p2 = scmp.eq.s32.totalorder %s1267_s22, 1  ;;  %p156_p3 = scmp.eq.s32.totalorder %s821_s23, 1 }
   0x9   : > { %p1276_p4 = por %p1485_p1, %p42_p0  ;;  %p822_p5 = scmp.ge.s32.totalorder %s1206_s21, 1 }
   0xa   : > { %p1281_p6 = por %p156_p3, %p42_p0  ;;  %p163_p7 = scmp.lt.s32.totalorder %s1206_s21, 3 }
   0xb   : > { %s1490_s24 = scalar_select %p1276_p4, 1, 0 }
   0xc   : > { %s1491_s25 = scalar_select %p1281_p6, 1, 0 }
   0xd   : > { %p1286_p8 = pnand %p822_p5, %p163_p7  ;;  %s1208_s27 = smov [#allocation5]  }
   0xe   : > { %s175_s28 = sshll.u32 %s1208_s27, 4  ;;  %s1209_s30 = smov [#allocation7]   ;;  %s176_s28 = int_to_ptr.vmem [resolvable:$true] %s175_s28 }
   0xf   : > { %s1492_s26 = scalar_select %p1286_p8, 1, 0 }
  0x10   : > { %p975_p9 = pneg %p1286_p8  ;;  %s191_s6 = sshll.u32 %s1209_s30, 4  ;;  %s192_s6 = int_to_ptr.vmem [resolvable:$true] %s191_s6 }
  0x11   : > { %s1069_s7 = scalar_lea.vmem %s176_s28, 1024  ;;  %p1077_p5 = scmp.lt.s32.totalorder %s176_s28, %s176_s28 }
  0x12   : > { %p1295_p11 = pnand %p975_p9, %p1485_p1  ;;  %p1070_p13 = scmp.ne.s32.totalorder %s176_s28, %s1069_s7 }
  0x13   : > { %p1078_p7 = scmp.lt.s32.totalorder %s1069_s7, %s1069_s7 }
  0x14   : > { %p1060_p12 = pneg %p1295_p11 }
  0x15   : > { %p1079_p10 = por %p1078_p7, %p1077_p5 }
  0x16   : > { %p1072_p0 = pnand %p1070_p13, %p1060_p12 }
  0x18   : > { %p1073_p3 = pneg %p1072_p0 }
  0x1a   : > { %p1080_p9 = pnand %p1079_p10, %p1073_p3 }
  0x1c   : > { %1083 = shalt.err (!%p1080_p9)
}
  0x1d   : > { %s1486_s8 = smov 64   ;;  %s1211_s9 = smov 4  }
  0x1e   : > { %978 = dma.hbm_to_vmem [thread:$0]  (!%p1295_p11), %s1480_s1, 1024, %s176_s28, [#allocation6], %s1486_s8, %s1486_s8, %s1211_s9  }
  0x1f   : > { %s1095_s12 = scalar_lea.vmem %s192_s6, 1024  ;;  %p1103_p10 = scmp.lt.s32.totalorder %s192_s6, %s192_s6 }
  0x20   : > { %p1096_p13 = scmp.ne.s32.totalorder %s192_s6, %s1095_s12  ;;  %p1104_p3 = scmp.lt.s32.totalorder %s1095_s12, %s1095_s12 }
  0x22   : > { %p1098_p0 = pnand %p1096_p13, %p1060_p12  ;;  %p1105_p7 = por %p1104_p3, %p1103_p10 }
  0x24   : > { %p1099_p5 = pneg %p1098_p0 }
  0x26   : > { %p1106_p9 = pnand %p1105_p7, %p1099_p5 }
  0x28   : > { %1109 = shalt.err (!%p1106_p9)
}
  0x29   : > { %981 = dma.hbm_to_vmem [thread:$0]  (!%p1295_p11), %s1482_s3, 1024, %s192_s6, [#allocation6], %s1486_s8, %s1486_s8, %s1211_s9  }
  0x2a   : > { %s1324_s15 = sadd.s32 1, %s1206_s21   ;;  %s29_s16 = sadd.s32 1, %s1202_s20 }
  0x2b   : > { %s26_s17 = ssub.s32 %s1206_s21, %s1324_s15  ;;  %p36_p12 = scmp.ne.s32.totalorder %s1202_s20, %s1198_s19 }
  0x2c   : > { %p27_p13 = scmp.eq.s32.totalorder %s26_s17, 0  ;;  %p37_p0 = scmp.eq.s32.totalorder %s1206_s21, 0 }
  0x2d   : > { %p1334_p5 = por %p150_p2, %p36_p12  ;;  %p992_p10 = scmp.lt.s32.totalorder %s1206_s21, 2 }
  0x2e   : > { %s1340_s27 = scalar_select %p27_p13, %s1202_s20, %s29_s16  }
  0x2f   : > { %s1494_s23 = scalar_select %p1334_p5, 1, 0 }
  0x30   : > { %p38_p3 = por %p37_p0, %p36_p12  ;;  %s208_s28 = sand.u32 1, %s1202_s20  }
  0x31   : > { %s826_s29 = sshll.u32 %s208_s28, 6  ;;  %s865_s30 = sshll.u32 %s1206_s21, 10 }
  0x32   : > { %s1347_s10 = scalar_lea.hbm %s1479_s0, %s865_s30  ;;  %s212_s11 = scalar_lea.vmem [#allocation2], %s826_s29 }
  0x33   : > { %s219_s12 = sshll.u32 %s212_s11, 4  ;;  %p1351_p2 = pnand %p992_p10, %p38_p3  ;;  %s1349_s12 = int_to_ptr.vmem [resolvable:$true] %s219_s12 }
  0x34   : > { %s1355_s14 = scalar_lea.sflag [#allocation3], %s208_s28  ;;  %s1110_s16 = scalar_lea.hbm %s1347_s10, 1024 }
  0x35   : > { %p1111_p11 = scmp.ne.s32.totalorder %s1347_s10, %s1110_s16  ;;  %p1112_p7 = pneg %p1351_p2 }
  0x36   : > { %s1115_s29 = scalar_lea.hbm %s1479_s0, 2048  ;;  %p1116_p13 = scmp.lt.s32.totalorder %s1347_s10, %s1479_s0 }
  0x37   : > { %p1113_p9 = pnand %p1112_p7, %p1111_p11  ;;  %p1117_p0 = scmp.lt.s32.totalorder %s1115_s29, %s1110_s16 }
  0x39   : > { %p1114_p12 = pneg %p1113_p9  ;;  %p1118_p10 = por %p1117_p0, %p1116_p13 }
  0x3b   : > { %p1119_p3 = pnand %p1118_p10, %p1114_p12 }
  0x3d   : > { %1122 = shalt.err (!%p1119_p3)
}
  0x3e   : > { %s1123_s28 = scalar_lea.vmem %s1349_s12, 1024  ;;  %s1212_s11 = smov [#allocation2]  }
  0x3f   : > { %p1124_p1 = scmp.ne.s32.totalorder %s1349_s12, %s1123_s28  ;;  %s1128_s8 = sshll.u32 %s1212_s11, 4  ;;  %s1129_s8 = int_to_ptr.vmem [resolvable:$false] %s1128_s8 }
  0x40   : > { %s1130_s17 = scalar_lea.vmem %s1129_s8, 2048  ;;  %p1131_p9 = scmp.lt.s32.totalorder %s1349_s12, %s1129_s8 }
  0x41   : > { %p1126_p6 = pnand %p1124_p1, %p1112_p7  ;;  %p1132_p5 = scmp.lt.s32.totalorder %s1130_s17, %s1123_s28 }
  0x43   : > { %p1127_p11 = pneg %p1126_p6  ;;  %p1133_p4 = por %p1132_p5, %p1131_p9 }
  0x45   : > { %p1134_p8 = pnand %p1133_p4, %p1127_p11 }
  0x47   : > { %1137 = shalt.err (!%p1134_p8)
}
  0x48   : > { %s1496_s16 = smov 64   ;;  %p1497_p1 = scmp.ne.s32.totalorder %s1492_s26, 0 }
  0x49   : > { %985 = dma.hbm_to_vmem [thread:$0]  (!%p1351_p2), %s1347_s10, 1024, %s1349_s12, %s1355_s14, %s1496_s16, %s1496_s16, %s1211_s9  }
  0x4a   : > { %231 = sbr.rel (%p1497_p1) target bundleno = 561 (0x231), region = 40  ;;  %s1382_s30 = sand.u32 (!%p1497_p1), 1, %s1198_s19  }
  0x4b   : > { %s830_s8 = sshll.u32 (!%p1497_p1), %s1382_s30, 6  ;;  %s234_s29 = scalar_lea.sflag (!%p1497_p1), [#allocation3], %s1382_s30 }
  0x4c   : > { %s1386_s6 = scalar_lea.vmem (!%p1497_p1), [#allocation2], %s830_s8  ;;  %p1498_p4 = scmp.ne.s32.totalorder (!%p1497_p1), %s1490_s24, 0 }
  0x4f   : > { %1181 = dma.done.wait (%p1498_p4), %s234_s29, 1024  }
  0x50   : > { %1183 = vsyncadd (%p1498_p4), %s234_s29, 4294966272  ;;  %p1499_p6 = scmp.eq.s32.totalorder %s1267_s22, 0 }
  0x52   : > { %1185 = dma.done.wait (%p1499_p6), [#allocation6], 2048   ;;  %p1500_p8 = pmov %p1499_p6 }
  0x53   : > { %v1034_v0 = vld [vmem:[#allocation5 + $0x38] sm:$0xff]   ;;  %v1035_v1 = vld [vmem:[#allocation5 + $0x30] sm:$0xff]   ;;  %v1036_v2 = vld [vmem:[#allocation5 + $0x28] sm:$0xff]   ;;  %s833_s9 = sshll.u32 %s1382_s30, 7  ;;  %s866_s14 = sshll.u32 %s1267_s22, 11 }
  0x54   : > { %1187 = vsyncadd (%p1500_p8), [#allocation6], 4294965248  ;;  %899 = vmatprep.subr.bf16.mxu0 %v1034_v0  ;;  %v1037_v3 = vld [vmem:[#allocation5 + $0x20] sm:$0xff]   ;;  %v1038_v5 = vld [vmem:[#allocation5 + $0x18] sm:$0xff]   ;;  %s1411_s13 = scalar_lea.vmem [#allocation8], %s833_s9  ;;  %s1432_s17 = scalar_lea.hbm %s1484_s5, %s866_s14 }
  0x55   : > { %900 = vmatpush3.bf16.msra.mxu0 %v1034_v0  ;;  %v1042_v4 = vld [vmem:[%s1386_s6] sm:$0xff]   ;;  %v1039_v6 = vld [vmem:[#allocation5 + $0x10] sm:$0xff]   ;;  %v1050_v7 = vld [vmem:[#allocation7 + $0x38] sm:$0xff]   ;;  %s729_s7 = sshll.u32 %s1411_s13, 4  ;;  %s716_s16 = scalar_lea.sflag [#allocation4], %s1382_s30  ;;  %s1434_s7 = int_to_ptr.vmem [resolvable:$true] %s729_s7 }
  0x56   : > { %901 = vmatprep.subr.bf16.mxu0 %v1035_v1  ;;  %915 = vmatprep.mubr.bf16.mxu0 %v1042_v4  ;;  %v1051_v8 = vld [vmem:[#allocation7 + $0x30] sm:$0xff]   ;;  %v1040_v9 = vld [vmem:[#allocation5 + $0x8] sm:$0xff]   ;;  %v1041_v11 = vld [vmem:[#allocation5] sm:$0xff]   ;;  %s1138_s22 = scalar_lea.vmem %s1434_s7, 2048  ;;  %p1501_p2 = scmp.ne.s32.totalorder %s1494_s23, 0 }
  0x57   : > { %931 = vmatprep.subr.bf16.mxu1 %v1050_v7  ;;  %v1052_v10 = vld [vmem:[#allocation7 + $0x28] sm:$0xff]   ;;  %v1053_v12 = vld [vmem:[#allocation7 + $0x20] sm:$0xff]   ;;  %v1054_v13 = vld [vmem:[#allocation7 + $0x18] sm:$0xff]   ;;  %p1139_p5 = scmp.ne.s32.totalorder %s1434_s7, %s1138_s22  ;;  %s1213_s8 = smov [#allocation8]  }
  0x58   : > { %932 = vmatpush3.bf16.msra.mxu1 %v1050_v7  ;;  %v1043_v14 = vld [vmem:[%s1386_s6 + $0x8] sm:$0xff]   ;;  %v1044_v15 = vld [vmem:[%s1386_s6 + $0x10] sm:$0xff]   ;;  %v1045_v16 = vld [vmem:[%s1386_s6 + $0x18] sm:$0xff]   ;;  %s1142_s29 = sshll.u32 %s1213_s8, 4  ;;  %s1143_s29 = int_to_ptr.vmem [resolvable:$false] %s1142_s29 }
  0x59   : > { %902 = vmatpush3.bf16.msra.mxu0 %v1035_v1  ;;  %933 = vmatprep.subr.bf16.mxu1 %v1051_v8  ;;  %v1046_v17 = vld [vmem:[%s1386_s6 + $0x20] sm:$0xff]   ;;  %v1047_v18 = vld [vmem:[%s1386_s6 + $0x28] sm:$0xff]   ;;  %v1048_v19 = vld [vmem:[%s1386_s6 + $0x30] sm:$0xff]   ;;  %p1140_p7 = pnand %p1139_p5, %p1501_p2  ;;  %p1145_p13 = scmp.lt.s32.totalorder %s1434_s7, %s1143_s29 }
  0x5a   : > { %903 = vmatprep.subr.bf16.mxu0 %v1036_v2  ;;  %v1049_v20 = vld [vmem:[%s1386_s6 + $0x38] sm:$0xff]   ;;  %v1055_v21 = vld [vmem:[#allocation7 + $0x10] sm:$0xff]   ;;  %v1056_v22 = vld [vmem:[#allocation7 + $0x8] sm:$0xff]   ;;  %s1144_s6 = scalar_lea.vmem %s1143_s29, 4096 }
  0x5b   : > { %v1057_v23 = vld [vmem:[#allocation7] sm:$0xff]   ;;  %p1141_p12 = pneg %p1140_p7  ;;  %p1146_p0 = scmp.lt.s32.totalorder %s1144_s6, %s1138_s22 }
  0x5c   : > { %934 = vmatpush3.bf16.msra.mxu1 %v1051_v8  ;;  %v834_v26 = vld [vmem:[%s1481_s2] ss:$0 sm:$0xff] }
  0x5d   : > { %904 = vmatpush3.bf16.msra.mxu0 %v1036_v2  ;;  %935 = vmatprep.subr.bf16.mxu1 %v1052_v10  ;;  %p1147_p10 = por %p1146_p0, %p1145_p13 }
  0x5e   : > { %905 = vmatprep.subr.bf16.mxu0 %v1037_v3 }
  0x5f   : > { %p1148_p3 = pnand %p1147_p10, %p1141_p12 }
  0x60   : > { %936 = vmatpush3.bf16.msra.mxu1 %v1052_v10 }
  0x61   : > { %906 = vmatpush3.bf16.msra.mxu0 %v1037_v3  ;;  %937 = vmatprep.subr.bf16.mxu1 %v1053_v12 }
  0x62   : > { %907 = vmatprep.subr.bf16.mxu0 %v1038_v5 }
  0x64   : > { %938 = vmatpush3.bf16.msra.mxu1 %v1053_v12 }
  0x65   : > { %908 = vmatpush3.bf16.msra.mxu0 %v1038_v5  ;;  %939 = vmatprep.subr.bf16.mxu1 %v1054_v13 }
  0x66   : > { %909 = vmatprep.subr.bf16.mxu0 %v1039_v6 }
  0x68   : > { %940 = vmatpush3.bf16.msra.mxu1 %v1054_v13 }
  0x69   : > { %910 = vmatpush3.bf16.msra.mxu0 %v1039_v6  ;;  %941 = vmatprep.subr.bf16.mxu1 %v1055_v21 }
  0x6a   : > { %911 = vmatprep.subr.bf16.mxu0 %v1040_v9 }
  0x6c   : > { %942 = vmatpush3.bf16.msra.mxu1 %v1055_v21 }
  0x6d   : > { %912 = vmatpush3.bf16.msra.mxu0 %v1040_v9  ;;  %943 = vmatprep.subr.bf16.mxu1 %v1056_v22 }
  0x6e   : > { %913 = vmatprep.subr.bf16.mxu0 %v1041_v11 }
  0x70   : > { %944 = vmatpush3.bf16.msra.mxu1 %v1056_v22 }
  0x71   : > { %914 = vmatpush3.bf16.msra.mxu0 %v1041_v11  ;;  %945 = vmatprep.subr.bf16.mxu1 %v1057_v23 }
  0x74   : > { %916 = vmatmul.mubr.bf16.vlgmr.msra.gmra.mxu0 %v1043_v14  ;;  %946 = vmatpush3.bf16.msra.mxu1 %v1057_v23 }
  0x75   : > { %919 = vmatprep.mubr.bf16.mxu0 %v1044_v15 }
  0x7c   : > { %920 = vmatmul.mubr.bf16.gmra.mxu0 %v1045_v16 }
  0x7d   : > { %923 = vmatprep.mubr.bf16.mxu0 %v1046_v17  ;;  %v851_v17 = vld [vmem:[%s1483_s4] ss:$0 sm:$0xff] }
  0x84   : > { %924 = vmatmul.mubr.bf16.gmra.mxu0 %v1047_v18 }
  0x85   : > { %927 = vmatprep.mubr.bf16.mxu0 %v1048_v19 }
  0x8c   : > { %928 = vmatmul.mubr.bf16.gmra.mxu0 %v1049_v20 }
 0x134   : > { %v917_v24 = vpop.f32.mrf.mxu0 }
 0x135   : > { %v453_v30 = vadd.f32 %v917_v24, %v834_v26 }
 0x136   : > { %v444_v25 = vpop.f32.mrf.mxu0 }
 0x137   : > { %v445_v28 = vadd.f32 %v834_v26, %v444_v25  ;;  %v509_v37 = vmax.f32 %v453_v30, 0.0 }
 0x138   : > { %v918_v27 = vpop.f32.mrf.mxu0 }
 0x139   : > { %v456_v29 = vadd.f32 %v918_v27, %v834_v26  ;;  %v507_v35 = vmax.f32 %v445_v28, 0.0 }
 0x13a   : > { %v447_v31 = vpop.f32.mrf.mxu0 }
 0x13b   : > { %v448_v32 = vadd.f32 %v834_v26, %v447_v31  ;;  %v510_v33 = vmax.f32 %v456_v29, 0.0 }
 0x13c   : > { %v921_v34 = vpop.f32.mrf.mxu0 }
 0x13d   : > { %v508_v36 = vmax.f32 %v448_v32, 0.0  ;;  %v524_v40 = vpack.c.bf16 %v510_v33, %v509_v37  ;;  %v469_v44 = vadd.f32 %v921_v34, %v834_v26 }
 0x13e   : > { %v460_v38 = vpop.f32.mrf.mxu0 }
 0x13f   : > { %v523_v39 = vpack.c.bf16 %v508_v36, %v507_v35  ;;  %v461_v42 = vadd.f32 %v834_v26, %v460_v38  ;;  %v513_v51 = vmax.f32 %v469_v44, 0.0 }
 0x140   : > { %v922_v41 = vpop.f32.mrf.mxu0 }
 0x141   : > { %v472_v43 = vadd.f32 %v922_v41, %v834_v26  ;;  %947 = vmatprep.mubr.bf16.mxu1 %v523_v39  ;;  %v511_v49 = vmax.f32 %v461_v42, 0.0 }
 0x142   : > { %v463_v45 = vpop.f32.mrf.mxu0  ;;  %948 = vmatmul.mubr.bf16.vlgmr.msra.gmra.mxu1 %v524_v40 }
 0x143   : > { %v464_v46 = vadd.f32 %v834_v26, %v463_v45  ;;  %v514_v47 = vmax.f32 %v472_v43, 0.0 }
 0x144   : > { %v925_v48 = vpop.f32.mrf.mxu0 }
 0x145   : > { %v512_v50 = vmax.f32 %v464_v46, 0.0  ;;  %v526_v54 = vpack.c.bf16 %v514_v47, %v513_v51  ;;  %v485_v58 = vadd.f32 %v925_v48, %v834_v26 }
 0x146   : > { %v476_v52 = vpop.f32.mrf.mxu0 }
 0x147   : > { %v525_v53 = vpack.c.bf16 %v512_v50, %v511_v49  ;;  %v477_v56 = vadd.f32 %v834_v26, %v476_v52  ;;  %v517_v1 = vmax.f32 %v485_v58, 0.0 }
 0x148   : > { %v926_v55 = vpop.f32.mrf.mxu0 }
 0x149   : > { %v488_v57 = vadd.f32 %v926_v55, %v834_v26  ;;  %951 = vmatprep.mubr.bf16.mxu1 %v525_v53  ;;  %v515_v63 = vmax.f32 %v477_v56, 0.0 }
 0x14a   : > { %v479_v59 = vpop.f32.mrf.mxu0  ;;  %952 = vmatmul.mubr.bf16.gmra.mxu1 %v526_v54 }
 0x14b   : > { %v480_v60 = vadd.f32 %v834_v26, %v479_v59  ;;  %v518_v61 = vmax.f32 %v488_v57, 0.0 }
 0x14c   : > { %v929_v62 = vpop.f32.mrf.mxu0 }
 0x14d   : > { %v516_v0 = vmax.f32 %v480_v60, 0.0  ;;  %v528_v4 = vpack.c.bf16 %v518_v61, %v517_v1  ;;  %v501_v8 = vadd.f32 %v929_v62, %v834_v26 }
 0x14e   : > { %v492_v2 = vpop.f32.mrf.mxu0 }
 0x14f   : > { %v527_v3 = vpack.c.bf16 %v516_v0, %v515_v63  ;;  %v493_v6 = vadd.f32 %v834_v26, %v492_v2  ;;  %v521_v14 = vmax.f32 %v501_v8, 0.0 }
 0x150   : > { %v930_v5 = vpop.f32.mrf.mxu0 }
 0x151   : > { %v504_v7 = vadd.f32 %v930_v5, %v834_v26  ;;  %955 = vmatprep.mubr.bf16.mxu1 %v527_v3  ;;  %v519_v12 = vmax.f32 %v493_v6, 0.0 }
 0x152   : > { %v495_v9 = vpop.f32.mrf.mxu0  ;;  %956 = vmatmul.mubr.bf16.gmra.mxu1 %v528_v4 }
 0x153   : > { %v496_v10 = vadd.f32 %v834_v26, %v495_v9  ;;  %v522_v11 = vmax.f32 %v504_v7, 0.0 }
 0x155   : > { %v520_v13 = vmax.f32 %v496_v10, 0.0  ;;  %v530_v16 = vpack.c.bf16 %v522_v11, %v521_v14 }
 0x157   : > { %v529_v15 = vpack.c.bf16 %v520_v13, %v519_v12 }
 0x159   : > { %959 = vmatprep.mubr.bf16.mxu1 %v529_v15 }
 0x15a   : > { %960 = vmatmul.mubr.bf16.gmra.mxu1 %v530_v16 }
 0x202   : > { %v949_v18 = vpop.f32.mrf.mxu1 }
 0x203   : > { %v645_v19 = vadd.f32 %v949_v18, %v851_v17 }
 0x204   : > { %v636_v20 = vpop.f32.mrf.mxu1 }
 0x205   : > { %701 = vst [vmem:[%s1411_s13 + $0x10] sm:$0xff] %v645_v19  ;;  %v637_v21 = vadd.f32 %v851_v17, %v636_v20 }
 0x206   : > { %v950_v22 = vpop.f32.mrf.mxu1 }
 0x207   : > { %699 = vst [vmem:[%s1411_s13] sm:$0xff] %v637_v21  ;;  %v648_v23 = vadd.f32 %v950_v22, %v851_v17 }
 0x208   : > { %v639_v24 = vpop.f32.mrf.mxu1 }
 0x209   : > { %702 = vst [vmem:[%s1411_s13 + $0x18] sm:$0xff] %v648_v23  ;;  %v640_v25 = vadd.f32 %v851_v17, %v639_v24 }
 0x20a   : > { %v953_v26 = vpop.f32.mrf.mxu1 }
 0x20b   : > { %700 = vst [vmem:[%s1411_s13 + $0x8] sm:$0xff] %v640_v25  ;;  %v661_v27 = vadd.f32 %v953_v26, %v851_v17 }
 0x20c   : > { %v652_v28 = vpop.f32.mrf.mxu1 }
 0x20d   : > { %705 = vst [vmem:[%s1411_s13 + $0x30] sm:$0xff] %v661_v27  ;;  %v653_v29 = vadd.f32 %v851_v17, %v652_v28 }
 0x20e   : > { %v954_v30 = vpop.f32.mrf.mxu1 }
 0x20f   : > { %703 = vst [vmem:[%s1411_s13 + $0x20] sm:$0xff] %v653_v29  ;;  %v664_v31 = vadd.f32 %v954_v30, %v851_v17 }
 0x210   : > { %v655_v32 = vpop.f32.mrf.mxu1 }
 0x211   : > { %706 = vst [vmem:[%s1411_s13 + $0x38] sm:$0xff] %v664_v31  ;;  %v656_v33 = vadd.f32 %v851_v17, %v655_v32 }
 0x212   : > { %v957_v34 = vpop.f32.mrf.mxu1 }
 0x213   : > { %704 = vst [vmem:[%s1411_s13 + $0x28] sm:$0xff] %v656_v33  ;;  %v677_v35 = vadd.f32 %v957_v34, %v851_v17 }
 0x214   : > { %v668_v36 = vpop.f32.mrf.mxu1 }
 0x215   : > { %709 = vst [vmem:[%s1411_s13 + $0x50] sm:$0xff] %v677_v35  ;;  %v669_v37 = vadd.f32 %v851_v17, %v668_v36 }
 0x216   : > { %v958_v38 = vpop.f32.mrf.mxu1 }
 0x217   : > { %707 = vst [vmem:[%s1411_s13 + $0x40] sm:$0xff] %v669_v37  ;;  %v680_v39 = vadd.f32 %v958_v38, %v851_v17 }
 0x218   : > { %v671_v40 = vpop.f32.mrf.mxu1 }
 0x219   : > { %710 = vst [vmem:[%s1411_s13 + $0x58] sm:$0xff] %v680_v39  ;;  %v672_v41 = vadd.f32 %v851_v17, %v671_v40 }
 0x21a   : > { %v961_v42 = vpop.f32.mrf.mxu1 }
 0x21b   : > { %708 = vst [vmem:[%s1411_s13 + $0x48] sm:$0xff] %v672_v41  ;;  %v693_v43 = vadd.f32 %v961_v42, %v851_v17 }
 0x21c   : > { %v684_v44 = vpop.f32.mrf.mxu1 }
 0x21d   : > { %713 = vst [vmem:[%s1411_s13 + $0x70] sm:$0xff] %v693_v43  ;;  %v685_v45 = vadd.f32 %v851_v17, %v684_v44 }
 0x21e   : > { %v962_v46 = vpop.f32.mrf.mxu1 }
 0x21f   : > { %711 = vst [vmem:[%s1411_s13 + $0x60] sm:$0xff] %v685_v45  ;;  %v696_v47 = vadd.f32 %v962_v46, %v851_v17 }
 0x220   : > { %v687_v48 = vpop.f32.mrf.mxu1 }
 0x221   : > { %714 = vst [vmem:[%s1411_s13 + $0x78] sm:$0xff] %v696_v47  ;;  %v688_v49 = vadd.f32 %v851_v17, %v687_v48 }
 0x223   : > { %712 = vst [vmem:[%s1411_s13 + $0x68] sm:$0xff] %v688_v49 }
 0x224   : > { %1151 = shalt.err (!%p1148_p3)
}
 0x225   : > { %s1152_s24 = scalar_lea.hbm %s1432_s17, 2048  ;;  %s1156_s10 = scalar_lea.hbm %s1484_s5, 4096 }
 0x226   : > { %p1153_p11 = scmp.ne.s32.totalorder %s1432_s17, %s1152_s24  ;;  %p1157_p4 = scmp.lt.s32.totalorder %s1432_s17, %s1484_s5 }
 0x227   : > { %p1158_p6 = scmp.lt.s32.totalorder %s1156_s10, %s1152_s24 }
 0x228   : > { %p1154_p9 = pnand %p1153_p11, %p1501_p2 }
 0x229   : > { %p1159_p8 = por %p1158_p6, %p1157_p4 }
 0x22a   : > { %p1155_p1 = pneg %p1154_p9 }
 0x22c   : > { %p1160_p5 = pnand %p1159_p8, %p1155_p1 }
 0x22e   : > { %1163 = shalt.err (!%p1160_p5)
}
 0x22f   : > { %s1214_s14 = smov 128   ;;  %s1215_s28 = smov 8  }
 0x230   : > { %973 = dma.vmem_to_hbm [thread:$0]  (%p1501_p2), %s1434_s7, 2048, %s1432_s17, %s716_s16, %s1214_s14, %s1214_s14, %s1215_s28  }
 0x231 PF: > { %s744_s11 = sand.u32 1, %s1194_s18   ;;  %p1502_p7 = scmp.ne.s32.totalorder %s1491_s25, 0 }
 0x232   : > { %p1503_p12 = scmp.ge.s32.totalorder %s1206_s21, 2  ;;  %s745_s22 = scalar_lea.sflag [#allocation4], %s744_s11 }
 0x234   : > { %p987_p13 = pnand %p1503_p12, %p1502_p7 }
 0x236   : > { %p988_p0 = pneg %p987_p13 }
 0x238   : > { %1189 = dma.done.wait (%p988_p0), %s745_s22, 2048  }
 0x239   : > { %1191 = vsyncadd (%p988_p0), %s745_s22, 4294965248  ;;  %p19_p10 = scmp.ge.s32.totalorder %s1324_s15, 4   ;;  %s1504_s18 = smov %s1198_s19 }
 0x23a   : > { %s1505_s19 = smov %s1202_s20  ;;  %s1506_s20 = smov %s1340_s27 }
 0x23b   : > { %s1507_s21 = smov %s1324_s15  ;;  %21 = sbr.rel (!%p19_p10) target bundleno = 6 (0x6), region = 93 }
 0x240   :  { %750 = vsyncpa [#allocation3], 1 }
 0x241   :  { %752 = vsyncpa [#allocation3 + $0x1], 1 }
 0x242   :  { %753 = vsyncpa [#allocation6], 1 }
 0x243   :  { %754 = vsyncpa [#allocation4], 1 }
 0x244   :  { %756 = vsyncpa [#allocation4 + $0x1], 1 }

</bundles_post_ra>
